<compile_context>
chip_gen: v7x
topology: tpu7x:2x2x1
jax: 0.10.0
libtpu: 0.0.40
codegen_flags: <defaults>
</compile_context>

<pallas_src>
from typing import Any, NamedTuple

import jax
import jax.numpy as jnp
from jax.experimental import pallas as pl
from jax.experimental.pallas import tpu as pltpu


def _round_up(x, m):
    return ((x + m - 1) // m) * m


# ----------------------------------------------------------------------------
# Kernels
# ----------------------------------------------------------------------------
def _flatten_head_single_k_kernel(x_ref, w_ref, b_ref, o_ref):
    # x_ref: [tm, K_pad], w_ref: [K_pad, tn], b_ref: [1, tn], o_ref: [tm, tn].
    acc = jnp.dot(x_ref[...], w_ref[...], preferred_element_type=jnp.float32)
    o_ref[...] = (acc + b_ref[...].astype(jnp.float32)).astype(o_ref.dtype)


def _flatten_head_multi_k_kernel(x_ref, w_ref, b_ref, o_ref, acc_ref):
    # Fallback for very large nf: x_ref [tm, tk], w_ref [tk, tn], K axis last.
    k = pl.program_id(2)

    @pl.when(k == 0)
    def _():
        acc_ref[...] = jnp.zeros_like(acc_ref)

    acc_ref[...] += jnp.dot(x_ref[...], w_ref[...],
                            preferred_element_type=jnp.float32)

    @pl.when(k == pl.num_programs(2) - 1)
    def _():
        o_ref[...] = (acc_ref[...] + b_ref[...].astype(jnp.float32)).astype(o_ref.dtype)


# ----------------------------------------------------------------------------
# Tile planning + one-time weight prepacking (module "state")
# ----------------------------------------------------------------------------
class FlattenHeadPlan(NamedTuple):
    M: int
    K: int
    N: int
    M_pad: int
    K_pad: int
    N_pad: int
    tm: int
    tk: int
    tn: int
    single_k: bool
    stream_dtype: Any          # jnp dtype or None (keep input dtype)


def _plan_tiles(M, K, N, elem_bytes, out_bytes=4, vmem_budget_bytes=12 << 20):
    # M: one i-tile covering all rows (up to 512) so the weight is streamed once.
    M_pad = _round_up(max(M, 1), 16)
    tm = min(M_pad, 512)
    M_pad = _round_up(M_pad, tm)

    # N: lane-dense blocks, ~N/2 (>=2 "parallel" j-tiles when N allows it, so
    # v7x megacore splits the weight stream), clamped to [128, 512].
    N_pad0 = _round_up(N, 128)
    tn = min(N_pad0, min(512, max(128, _round_up((N_pad0 + 1) // 2, 128))))
    N_pad = _round_up(N, tn)

    # K: single block whenever the double-buffered working set fits the budget
    # (12 MiB default: under the 16 MiB v5e scoped-VMEM default and far under
    # v6e/v7x limits, so no vmem_limit_bytes override is needed).
    K_pad = _round_up(K, 128)

    def working_set(tk_):
        return (2 * tm * tk_ * elem_bytes      # x blocks (double-buffered)
                + 2 * tk_ * tn * elem_bytes    # w blocks (double-buffered)
                + 2 * tm * tn * out_bytes)     # out blocks

    if working_set(K_pad) <= vmem_budget_bytes:
        tk = K_pad
        single_k = True
    else:
        single_k = False
        tk = 2048
        while tk > 256 and working_set(tk) + tm * tn * 4 > vmem_budget_bytes:
            tk //= 2
        K_pad = _round_up(K, tk)

    return FlattenHeadPlan(M, K, N, M_pad, K_pad, N_pad, tm, tk, tn,
                           single_k, None)


def prepack_flatten_head(weight, bias, batch_times_vars,
                         stream_dtype=jnp.bfloat16,
                         vmem_budget_bytes=12 << 20):
    """One-time parameter packing (do this once, outside the per-call path).

    weight: [target_window, nf]  (PyTorch nn.Linear layout)
    bias:   [target_window]
    Returns (plan, w_packed [K_pad, N_pad], b_packed [1, N_pad]).
    """
    N, K = weight.shape
    elem_bytes = jnp.dtype(stream_dtype if stream_dtype is not None
                           else weight.dtype).itemsize
    plan = _plan_tiles(batch_times_vars, K, N, elem_bytes,
                       vmem_budget_bytes=vmem_budget_bytes)
    plan = plan._replace(stream_dtype=stream_dtype)

    w = weight.astype(stream_dtype) if stream_dtype is not None else weight
    # Fold the transpose into the one-time pack: store [K_pad, N_pad] so the
    # in-kernel dot contracts the leading axis of the weight block directly.
    w_packed = jnp.pad(w.T, ((0, plan.K_pad - K), (0, plan.N_pad - N)))
    b_packed = jnp.pad(bias, (0, plan.N_pad - N)).reshape(1, plan.N_pad)
    return plan, w_packed, b_packed


# ----------------------------------------------------------------------------
# Forward
# ----------------------------------------------------------------------------
def flatten_head_forward(x, plan, w_packed, b_packed):
    """x: [B, n_vars, d_model, patch_num] -> [B, n_vars, target_window]."""
    B, n_vars, d_model, patch_num = x.shape
    M, K = B * n_vars, d_model * patch_num
    assert M == plan.M and K == plan.K, "prepacked plan does not match input"
    out_dtype = x.dtype

    # Flatten(start_dim=-2): row-major merge of the last two dims (glue JAX).
    x2d = x.reshape(M, K)
    if plan.stream_dtype is not None:
        x2d = x2d.astype(plan.stream_dtype)
    x2d = jnp.pad(x2d, ((0, plan.M_pad - M), (0, plan.K_pad - K)))

    if plan.single_k:
        grid = (plan.M_pad // plan.tm, plan.N_pad // plan.tn)
        out2d = pl.pallas_call(
            _flatten_head_single_k_kernel,
            out_shape=jax.ShapeDtypeStruct((plan.M_pad, plan.N_pad), out_dtype),
            grid_spec=pltpu.PrefetchScalarGridSpec(
                num_scalar_prefetch=0,
                grid=grid,
                in_specs=[
                    pl.BlockSpec((plan.tm, plan.K_pad), lambda i, j: (i, 0)),
                    pl.BlockSpec((plan.K_pad, plan.tn), lambda i, j: (0, j)),
                    pl.BlockSpec((1, plan.tn), lambda i, j: (0, j)),
                ],
                out_specs=pl.BlockSpec((plan.tm, plan.tn), lambda i, j: (i, j)),
            ),
            compiler_params=pltpu.CompilerParams(
                dimension_semantics=("parallel", "parallel")),
        )(x2d, w_packed, b_packed)
    else:
        grid = (plan.M_pad // plan.tm, plan.N_pad // plan.tn,
                plan.K_pad // plan.tk)
        out2d = pl.pallas_call(
            _flatten_head_multi_k_kernel,
            out_shape=jax.ShapeDtypeStruct((plan.M_pad, plan.N_pad), out_dtype),
            grid_spec=pltpu.PrefetchScalarGridSpec(
                num_scalar_prefetch=0,
                grid=grid,
                in_specs=[
                    pl.BlockSpec((plan.tm, plan.tk), lambda i, j, k: (i, k)),
                    pl.BlockSpec((plan.tk, plan.tn), lambda i, j, k: (k, j)),
                    pl.BlockSpec((1, plan.tn), lambda i, j, k: (0, j)),
                ],
                out_specs=pl.BlockSpec((plan.tm, plan.tn),
                                       lambda i, j, k: (i, j)),
                scratch_shapes=[pltpu.VMEM((plan.tm, plan.tn), jnp.float32)],
            ),
            compiler_params=pltpu.CompilerParams(
                dimension_semantics=("parallel", "parallel", "arbitrary")),
        )(x2d, w_packed, b_packed)

    out = out2d[:M, :plan.N].reshape(B, n_vars, plan.N)
    # Dropout: nn.Dropout is identity at inference.
    # TODO(synk): training-mode dropout (pltpu.prng_random_bits mask) omitted.
    return out


# ----------------------------------------------------------------------------
# Self-test
# ----------------------------------------------------------------------------
if __name__ == "__main__":
    B, n_vars, d_model, patch_num = 2, 4, 8, 4
    nf = d_model * patch_num            # 32
    target_window = 16

    key = jax.random.PRNGKey(0)
    kx, kw, kb = jax.random.split(key, 3)
    x = jax.random.normal(kx, (B, n_vars, d_model, patch_num), dtype=jnp.float32)
    weight = jax.random.normal(kw, (target_window, nf), dtype=jnp.float32) * (1.0 / jnp.sqrt(nf))
    bias = jax.random.normal(kb, (target_window,), dtype=jnp.float32) * 0.01

    # Pure-JAX reference.
    ref = x.reshape(B, n_vars, nf) @ weight.T + bias

    # 1) f32 streaming, fused single-K kernel (tolerance allows MXU f32 rounding).
    plan_f32, wp_f32, bp_f32 = prepack_flatten_head(
        weight, bias, B * n_vars, stream_dtype=None)
    assert plan_f32.single_k
    out_f32 = jax.block_until_ready(flatten_head_forward(x, plan_f32, wp_f32, bp_f32))
    assert out_f32.shape == (B, n_vars, target_window)
    assert jnp.allclose(out_f32, ref, atol=2e-3, rtol=2e-3)

    # 2) bf16 streaming (default perf configuration): f32 accumulation,
    #    bf16-level tolerance vs the f32 reference.
    plan_bf, wp_bf, bp_bf = prepack_flatten_head(weight, bias, B * n_vars)
    out_bf = jax.block_until_ready(flatten_head_forward(x, plan_bf, wp_bf, bp_bf))
    assert out_bf.shape == (B, n_vars, target_window)
    assert jnp.allclose(out_bf, ref, atol=3e-2, rtol=3e-2)

    # 3) Coverage of the multi-K accumulator fallback: force it with a tiny
    #    artificial VMEM budget on a larger nf.
    d2, p2 = 32, 16                      # nf2 = 512
    x2 = jax.random.normal(kx, (B, n_vars, d2, p2), dtype=jnp.float32)
    w2 = jax.random.normal(kw, (target_window, d2 * p2), dtype=jnp.float32) * (1.0 / jnp.sqrt(d2 * p2))
    ref2 = x2.reshape(B, n_vars, d2 * p2) @ w2.T + bias
    plan_mk, wp_mk, bp_mk = prepack_flatten_head(
        w2, bias, B * n_vars, stream_dtype=None, vmem_budget_bytes=256 * 1024)
    assert (not plan_mk.single_k) and plan_mk.K_pad // plan_mk.tk >= 2
    out_mk = jax.block_until_ready(flatten_head_forward(x2, plan_mk, wp_mk, bp_mk))
    assert jnp.allclose(out_mk, ref2, atol=2e-3, rtol=2e-3)

    print("KERNEL_OK")
</pallas_src>

<mosaic_0001>
module attributes {stable_mosaic.version = 11 : i64} {
  func.func @_flatten_head_single_k_kernel(%arg0: i32, %arg1: i32, %arg2: memref<16x128xf32, #tpu.memory_space<vmem>>, %arg3: memref<128x128xf32, #tpu.memory_space<vmem>>, %arg4: memref<1x128xf32, #tpu.memory_space<vmem>>, %arg5: memref<16x128xf32, #tpu.memory_space<vmem>>) attributes {dimension_semantics = [#tpu.dimension_semantics<parallel>, #tpu.dimension_semantics<parallel>], iteration_bounds = array<i64: 1, 1>, scalar_prefetch = 0 : i64, scratch_operands = 0 : i64, tpu.core_type = #tpu.core_type<tc>, window_params = [{transform_indices = @transform_0, window_bounds = array<i64: 16, 128>}, {transform_indices = @transform_1, window_bounds = array<i64: 128, 128>}, {transform_indices = @transform_2, window_bounds = array<i64: 1, 128>}, {transform_indices = @transform_3, window_bounds = array<i64: 16, 128>}]} {
    %c0 = arith.constant 0 : index
    %c0_0 = arith.constant 0 : index
    %0 = vector.load %arg2[%c0, %c0_0] : memref<16x128xf32, #tpu.memory_space<vmem>>, vector<16x128xf32>
    %c0_1 = arith.constant 0 : index
    %c0_2 = arith.constant 0 : index
    %1 = vector.load %arg3[%c0_1, %c0_2] : memref<128x128xf32, #tpu.memory_space<vmem>>, vector<128x128xf32>
    %cst = arith.constant dense<0.000000e+00> : vector<16x128xf32>
    %2 = tpu.matmul %0, %1, %cst {dimension_numbers = #tpu.dot_dimension_numbers<[1], [0], [0], [1], [0, 0, 1, 1], [], []>} : vector<16x128xf32>, vector<128x128xf32>, vector<16x128xf32> -> vector<16x128xf32>
    %c0_3 = arith.constant 0 : index
    %c0_4 = arith.constant 0 : index
    %3 = vector.load %arg4[%c0_3, %c0_4] : memref<1x128xf32, #tpu.memory_space<vmem>>, vector<1x128xf32>
    %4 = vector.broadcast %3 : vector<1x128xf32> to vector<16x128xf32>
    %5 = arith.addf %2, %4 : vector<16x128xf32>
    %c0_5 = arith.constant 0 : index
    %c0_6 = arith.constant 0 : index
    %6 = vector.load %arg5[%c0_5, %c0_6] : memref<16x128xf32, #tpu.memory_space<vmem>>, vector<16x128xf32>
    tpu.vector_store %arg5[%c0_5, %c0_6], %5 {strides = array<i32>} : memref<16x128xf32, #tpu.memory_space<vmem>>, vector<16x128xf32>,
    return
  }
  func.func @transform_0(%arg0: i32, %arg1: i32) -> (i32, i32) {
    %c0_i32 = arith.constant 0 : i32
    %c0_i32_0 = arith.constant 0 : i32
    return %arg0, %c0_i32 : i32, i32
  }
  func.func @transform_1(%arg0: i32, %arg1: i32) -> (i32, i32) {
    %c0_i32 = arith.constant 0 : i32
    %c0_i32_0 = arith.constant 0 : i32
    return %c0_i32, %arg1 : i32, i32
  }
  func.func @transform_2(%arg0: i32, %arg1: i32) -> (i32, i32) {
    %c0_i32 = arith.constant 0 : i32
    %c0_i32_0 = arith.constant 0 : i32
    return %c0_i32, %arg1 : i32, i32
  }
  func.func @transform_3(%arg0: i32, %arg1: i32) -> (i32, i32) {
    %c0_i32 = arith.constant 0 : i32
    return %arg0, %arg1 : i32, i32
  }
}

</mosaic_0001>

<bundles_post_ra>
// kernel: tpu_custom_call.1
= control target key start
LH: loop header
LB: loop body
LE: loop exit
PB: predicated region body
PF: predicated region fallthrough
CT: control target
= control target key end

     0   :  { %8 = vsyncpa [#allocation3], 0  ;;  %s399_s0 = inlined_call_operand.hbm [shape: f32[16,128], index: 0, kind: input, shape index: {}]   ;;  %s400_s1 = inlined_call_operand.hbm [shape: f32[128,128], index: 1, kind: input, shape index: {}]   ;;  %s401_s2 = inlined_call_operand.vmem [shape: f32[1,128], index: 2, kind: input, shape index: {}]   ;;  %s402_s3 = inlined_call_operand.hbm [shape: f32[16,128], index: 3, kind: output, shape index: {}]  }
   0x1   :  { %9 = vsyncpa [#allocation6], 0 }
   0x2   :  { %10 = vsyncpa [#allocation4], 0  ;;  %s326_s12 = smov [#allocation2]   ;;  %s254_s16 = scalar_lea.hbm %s399_s0, 256 }
   0x3   :  { %s16_s13 = sshll.u32 %s326_s12, 4  ;;  %p255_p0 = scmp.ne.s32.totalorder %s399_s0, %s254_s16  ;;  %s17_s13 = int_to_ptr.vmem [resolvable:$true] %s16_s13 }
   0x4   :  { %p258_p1 = scmp.lt.u32.totalorder %s254_s16, %s399_s0 }
   0x6   :  { %p260_p2 = pnand %p258_p1, %p255_p0 }
   0x8   :  { %263 = shalt.err (!%p260_p2)
}
   0x9   :  { %s264_s21 = scalar_lea.vmem %s17_s13, 256  ;;  %p269_p4 = scmp.lt.s32.totalorder %s17_s13, %s17_s13 }
   0xa   :  { %p265_p3 = scmp.ne.s32.totalorder %s17_s13, %s264_s21  ;;  %p270_p5 = scmp.lt.s32.totalorder %s264_s21, %s264_s21 }
   0xc   :  { %p271_p6 = por %p270_p5, %p269_p4 }
   0xe   :  { %p272_p7 = pnand %p271_p6, %p265_p3 }
  0x10   :  { %275 = shalt.err (!%p272_p7)
}
  0x11   :  { %s327_s22 = smov 128   ;;  %s328_s23 = smov 8  }
  0x12   :  { %22 = dma.hbm_to_vmem [thread:$0]  %s399_s0, 256, %s17_s13, [#allocation3], %s327_s22, %s327_s22, %s328_s23  }
  0x13   :  { %s329_s26 = smov [#allocation5]   ;;  %s276_s30 = scalar_lea.hbm %s400_s1, 2048 }
  0x14   :  { %s28_s27 = sshll.u32 %s329_s26, 4  ;;  %p277_p8 = scmp.ne.s32.totalorder %s400_s1, %s276_s30  ;;  %s29_s27 = int_to_ptr.vmem [resolvable:$true] %s28_s27 }
  0x15   :  { %p280_p9 = scmp.lt.u32.totalorder %s276_s30, %s400_s1 }
  0x17   :  { %p282_p10 = pnand %p280_p9, %p277_p8 }
  0x19   :  { %285 = shalt.err (!%p282_p10)
}
  0x1a   :  { %s286_s8 = scalar_lea.vmem %s29_s27, 2048  ;;  %p291_p12 = scmp.lt.s32.totalorder %s29_s27, %s29_s27 }
  0x1b   :  { %p287_p11 = scmp.ne.s32.totalorder %s29_s27, %s286_s8  ;;  %p292_p13 = scmp.lt.s32.totalorder %s286_s8, %s286_s8 }
  0x1d   :  { %p293_p0 = por %p292_p13, %p291_p12 }
  0x1f   :  { %p294_p1 = pnand %p293_p0, %p287_p11 }
  0x21   :  { %297 = shalt.err (!%p294_p1)
}
  0x22   :  { %34 = dma.hbm_to_vmem [thread:$0]  %s400_s1, 2048, %s29_s27, [#allocation6], %s327_s22, %s327_s22, %s328_s23  }
  0x23   :  { %320 = dma.done.wait [#allocation3], 256  }
  0x24   :  { %321 = vsyncadd [#allocation3], 4294967040 }
  0x25   :  { %322 = dma.done.wait [#allocation6], 2048  }
  0x26   :  { %323 = vsyncadd [#allocation6], 4294965248  ;;  %v45_v0 = vld [vmem:[#allocation5] sm:$0xff]  ;;  %v46_v1 = vld [vmem:[#allocation5 + $0x8] sm:$0xff]  ;;  %s330_s11 = smov [#allocation7]  }
  0x27   :  { %v47_v2 = vld [vmem:[#allocation5 + $0x10] sm:$0xff]  ;;  %v217_v3 = vpack.c.bf16 %v46_v1, %v45_v0  ;;  %v48_v4 = vld [vmem:[#allocation5 + $0x18] sm:$0xff]  ;;  %v49_v6 = vld [vmem:[#allocation5 + $0x20] sm:$0xff]  ;;  %s150_s12 = sshll.u32 %s330_s11, 4  ;;  %s151_s12 = int_to_ptr.vmem [resolvable:$true] %s150_s12 }
  0x28   :  { %v221_v5 = vpack.c.bf16 %v48_v4, %v47_v2  ;;  %v50_v7 = vld [vmem:[#allocation5 + $0x28] sm:$0xff]  ;;  %v43_v9 = vld [vmem:[#allocation2] sm:$0xff]  ;;  %v52_v11 = vld [vmem:[#allocation5 + $0x38] sm:$0xff]  ;;  %s298_s13 = scalar_lea.vmem %s151_s12, 256  ;;  %p303_p3 = scmp.lt.s32.totalorder %s151_s12, %s151_s12 }
  0x29   :  { %218 = vmatprep.subr.bf16.mxu0 %v217_v3  ;;  %v225_v8 = vpack.c.bf16 %v50_v7, %v49_v6  ;;  %v51_v10 = vld [vmem:[#allocation5 + $0x30] sm:$0xff]  ;;  %214 = vmatprep.mubr.f32.mxu0 %v43_v9  ;;  %v53_v13 = vld [vmem:[#allocation5 + $0x40] sm:$0xff]  ;;  %v54_v14 = vld [vmem:[#allocation5 + $0x48] sm:$0xff]  ;;  %p299_p2 = scmp.ne.s32.totalorder %s151_s12, %s298_s13  ;;  %p304_p4 = scmp.lt.s32.totalorder %s298_s13, %s298_s13 }
  0x2a   :  { %220 = vmatpush3.bf16.msra.mxu0 %v217_v3  ;;  %v229_v12 = vpack.c.bf16 %v52_v11, %v51_v10  ;;  %v233_v15 = vpack.c.bf16 %v54_v14, %v53_v13  ;;  %v55_v16 = vld [vmem:[#allocation5 + $0x50] sm:$0xff]  ;;  %v56_v17 = vld [vmem:[#allocation5 + $0x58] sm:$0xff]  ;;  %v57_v19 = vld [vmem:[#allocation5 + $0x60] sm:$0xff] }
  0x2b   :  { %222 = vmatprep.subr.bf16.mxu0 %v221_v5  ;;  %v237_v18 = vpack.c.bf16 %v56_v17, %v55_v16  ;;  %v58_v20 = vld [vmem:[#allocation5 + $0x68] sm:$0xff]  ;;  %v59_v22 = vld [vmem:[#allocation5 + $0x70] sm:$0xff]  ;;  %v60_v23 = vld [vmem:[#allocation5 + $0x78] sm:$0xff]  ;;  %p305_p5 = por %p304_p4, %p303_p3 }
  0x2c   :  { %v241_v21 = vpack.c.bf16 %v58_v20, %v57_v19  ;;  %v245_v24 = vpack.c.bf16 %v60_v23, %v59_v22  ;;  %v44_v25 = vld [vmem:[#allocation2 + $0x8] sm:$0xff]  ;;  %v163_v26 = vld [vmem:[%s401_s2] ss:$0 sm:$0xff] }
  0x2d   :  { %p306_p6 = pnand %p305_p5, %p299_p2 }
  0x2e   :  { %224 = vmatpush3.bf16.msra.mxu0 %v221_v5 }
  0x2f   :  { %226 = vmatprep.subr.bf16.mxu0 %v225_v8 }
  0x32   :  { %228 = vmatpush3.bf16.msra.mxu0 %v225_v8 }
  0x33   :  { %230 = vmatprep.subr.bf16.mxu0 %v229_v12 }
  0x36   :  { %232 = vmatpush3.bf16.msra.mxu0 %v229_v12 }
  0x37   :  { %234 = vmatprep.subr.bf16.mxu0 %v233_v15 }
  0x3a   :  { %236 = vmatpush3.bf16.msra.mxu0 %v233_v15 }
  0x3b   :  { %238 = vmatprep.subr.bf16.mxu0 %v237_v18 }
  0x3e   :  { %240 = vmatpush3.bf16.msra.mxu0 %v237_v18 }
  0x3f   :  { %242 = vmatprep.subr.bf16.mxu0 %v241_v21 }
  0x42   :  { %244 = vmatpush3.bf16.msra.mxu0 %v241_v21 }
  0x43   :  { %246 = vmatprep.subr.bf16.mxu0 %v245_v24 }
  0x46   :  { %248 = vmatpush3.bf16.msra.mxu0 %v245_v24 }
  0x49   :  { %215 = vmatmul.mubr.f32.vlgmr.msra.gmra.mrb[0].mxu0 %v44_v25 }
 0x11c   :  { %v216_v27 = vpop.f32.mrb[0].mxu0 }
 0x11d   :  { %v140_v28 = vadd.f32 %v216_v27, %v163_v26  ;;  %v134_v29 = vpop.f32.mrb[1].mxu0 }
 0x11e   :  { %v135_v30 = vadd.f32 %v163_v26, %v134_v29 }
 0x11f   :  { %144 = vst [vmem:[#allocation7 + $0x8] sm:$0xff] %v140_v28 }
 0x120   :  { %143 = vst [vmem:[#allocation7] sm:$0xff] %v135_v30 }
 0x121   :  { %309 = shalt.err (!%p306_p6)
}
 0x122   :  { %s310_s2 = scalar_lea.hbm %s402_s3, 256 }
 0x123   :  { %p311_p7 = scmp.ne.s32.totalorder %s402_s3, %s310_s2  ;;  %p314_p8 = scmp.lt.u32.totalorder %s310_s2, %s402_s3 }
 0x125   :  { %p316_p9 = pnand %p314_p8, %p311_p7 }
 0x127   :  { %319 = shalt.err (!%p316_p9)
}
 0x128   :  { %156 = dma.vmem_to_hbm [thread:$0]  %s151_s12, 256, %s402_s3, [#allocation4], %s327_s22, %s327_s22, %s328_s23  }
 0x129   :  { %324 = dma.done.wait [#allocation4], 256  }
 0x12a   :  { %325 = vsyncadd [#allocation4], 4294967040 }
 0x12b   :  { %160 = vsyncpa [#allocation3], 1 }
 0x12c   :  { %161 = vsyncpa [#allocation6], 1 }
 0x12d   :  { %162 = vsyncpa [#allocation4], 1 }

</bundles_post_ra>
